<compile_context>
chip_gen: v5e
topology: v5e:2x2
jax: 0.10.0
libtpu: 0.0.40
codegen_flags: <defaults>
</compile_context>

<pallas_src>
import jax
import jax.numpy as jnp
from jax.experimental import pallas as pl
from jax.experimental.pallas import tpu as pltpu


# ----------------------------------------------------------------------------- parameters

def _fold_params(params, W, compute_dtype):
    """Tile per-channel depthwise weights/biases along W so they broadcast over the folded
    lane axis (lane index = w*C + c). Cast to the kernel compute dtype on the host."""
    w1, b1, w3a, b3a, w3b1, b3b1, w3b2, b3b2 = params
    C = b1.shape[0]
    WC = W * C

    def tile_vec(v):                       # (C,) -> (1, W*C)
        return jnp.tile(v.astype(compute_dtype).reshape(C), (W,)).reshape(1, WC)

    def tile_kern(k):                      # (3,3,C) -> (9, W*C), row k = (dh*3 + dw)
        return jnp.tile(k.astype(compute_dtype).reshape(9, C), (1, W)).reshape(9, WC)

    return (tile_vec(w1.reshape(C)), tile_vec(b1),
            tile_kern(w3a), tile_vec(b3a),
            tile_kern(w3b1), tile_vec(b3b1),
            tile_kern(w3b2), tile_vec(b3b2))


# ----------------------------------------------------------------------------- VMEM sizing

def _round_up(x, m):
    return -(-x // m) * m


def _tile_bytes(shape, dtype):
    """VMEM bytes for one buffer of `shape`: last dim padded to 128 lanes, second-minor to
    the dtype's sublane tile (8 rows f32, 16 rows bf16)."""
    itemsize = jnp.dtype(dtype).itemsize
    sub = max(8, 32 // itemsize)
    dims = list(shape)
    dims[-1] = _round_up(dims[-1], 128)
    if len(dims) >= 2:
        dims[-2] = _round_up(dims[-2], sub)
    n = 1
    for d in dims:
        n *= d
    return n * itemsize


def _vmem_footprint(NB, H, W, C, in_dtype, compute_dtype, rows):
    """Per-grid-step VMEM footprint: double-buffered input/output/weight blocks + the two
    persistent halo scratches."""
    WC = W * C
    f = 2 * _tile_bytes((NB, H, WC), in_dtype)          # input block
    f += 2 * _tile_bytes((NB, H, 3 * WC), in_dtype)     # output block
    for shp in [(1, WC)] * 5 + [(9, WC)] * 3:           # weights / biases
        f += 2 * _tile_bytes(shp, compute_dtype)
    f += 2 * _tile_bytes((rows, WC), compute_dtype)     # x / y1 row-halo scratches
    return f


def _pick_batch_block(N, H, W, C, in_dtype, compute_dtype,
                      budget_bytes=32 * 1024 * 1024, max_nb=8, min_steps=4):
    """Largest divisor of N that (a) keeps the grid >= min_steps long when N allows, so the
    BlockSpec pipeline actually overlaps DMA with compute, (b) stays small enough that the
    static per-image unroll doesn't blow vreg live ranges, (c) fits the VMEM budget."""
    cap = max(1, min(max_nb, max(1, N // min_steps), N))
    nb = 1
    for d in range(1, cap + 1):
        if N % d:
            continue
        rows = d * (H + 8) + 8
        if _vmem_footprint(d, H, W, C, in_dtype, compute_dtype, rows) <= budget_bytes:
            nb = d
    return nb


# ----------------------------------------------------------------------------- kernel

def _make_kernel(NB, H, W, C, compute_dtype):
    WC = W * C
    RPI = H + 8                              # rows per image region in the scratch
    cdt = compute_dtype

    def kernel(xf_ref, w1_ref, b1_ref, w3a_ref, b3a_ref,
               w3b1_ref, b3b1_ref, w3b2_ref, b3b2_ref,
               out_ref, xpad_ref, y1pad_ref):
        # Hoist all per-tap weight rows / biases out of the batch loop (JAX does not CSE
        # broadcast_in_dim; re-reading per image would re-emit 27 loads+broadcasts/image).
        w1t = w1_ref[0]
        b1t = b1_ref[0]
        b3at = b3a_ref[0]
        b3b1t = b3b1_ref[0]
        b3b2t = b3b2_ref[0]
        w3a_rows = [w3a_ref[k] for k in range(9)]
        w3b1_rows = [w3b1_ref[k] for k in range(9)]
        w3b2_rows = [w3b2_ref[k] for k in range(9)]

        zrow = jnp.zeros((1, WC), cdt)
        zcol = jnp.zeros((H, C), cdt)

        def lane_taps(band):
            # SAME-padded width taps built in registers (lane-aligned; the minor-axis
            # concats are XLU work, which has slack in this VALU-bound kernel).
            left = jnp.concatenate([zcol, band[:, :WC - C]], axis=-1)    # x[.., w-1, c]
            right = jnp.concatenate([band[:, C:], zcol], axis=-1)        # x[.., w+1, c]
            return (left, band, right)

        def conv3x3(bands, w_rows, bias):
            acc = None
            for dh in range(3):
                wins = lane_taps(bands[dh])
                for dw in range(3):
                    t = wins[dw] * w_rows[dh * 3 + dw]
                    acc = t if acc is None else acc + t
            return acc + bias

        # NB is capped small (<= 8) so a static unroll is fine; for much larger blocks this
        # should become a lax.fori_loop with pl.ds row indexing to bound vreg live ranges.
        for b in range(NB):
            r0 = b * RPI + 8                       # sublane-aligned interior start
            xb = xf_ref[b].astype(cdt)             # (H, WC)

            # Branch 1: 1x1 depthwise conv == per-channel scale + bias.
            x1 = xb * w1t + b1t

            # Stage the image plus its two zero halo rows EVERY step (megacore-safe:
            # everything read below is written here, so the grid axis can be "parallel").
            xpad_ref[r0 - 1:r0, :] = zrow
            xpad_ref[r0:r0 + H, :] = xb
            xpad_ref[r0 + H:r0 + H + 1, :] = zrow

            bands = (xpad_ref[r0 - 1:r0 - 1 + H, :],     # rows h-1 (dh = 0)
                     xb,                                 # rows h   (dh = 1)
                     xpad_ref[r0 + 1:r0 + 1 + H, :])     # rows h+1 (dh = 2)

            # Branches 2 and 3a share the nine shifted windows.
            acc2 = None
            acc3 = None
            for dh in range(3):
                wins = lane_taps(bands[dh])
                for dw in range(3):
                    k = dh * 3 + dw
                    t2 = wins[dw] * w3a_rows[k]
                    t3 = wins[dw] * w3b1_rows[k]
                    acc2 = t2 if acc2 is None else acc2 + t2
                    acc3 = t3 if acc3 is None else acc3 + t3
            x2 = acc2 + b3at
            y1 = acc3 + b3b1t

            # Chained conv: restage y1 (with its halo rows), then 3x3 again.
            y1pad_ref[r0 - 1:r0, :] = zrow
            y1pad_ref[r0:r0 + H, :] = y1
            y1pad_ref[r0 + H:r0 + H + 1, :] = zrow
            ybands = (y1pad_ref[r0 - 1:r0 - 1 + H, :], y1,
                      y1pad_ref[r0 + 1:r0 + 1 + H, :])
            x3 = conv3x3(ybands, w3b2_rows, b3b2t)

            # Single lane-dense store: [x1 | x2 | x3] along lanes (width 3*W*C).
            out_ref[b] = jnp.concatenate([x1, x2, x3], axis=-1).astype(out_ref.dtype)

    return kernel


# ----------------------------------------------------------------------------- wrapper

def xception_conv(x_nhwc, params, *, compute_dtype=jnp.float32,
                  batch_block=None, unfold=True):
    """x_nhwc: (N, H, W, C), f32 or bf16.  params: tuple of 8 arrays (see init_params).

    compute_dtype: jnp.float32 (default; required accuracy / v5e) or jnp.bfloat16
        (packed-bf16 VALU math; recommended on v6e/v7x where the kernel is compute-bound).
    unfold: if True return NHWC (N, H, W, 3C) matching torch.cat(..., dim=1); if False
        return the folded (N, H, 3*W*C) array (lane = branch*W*C + w*C + c) and skip the
        extra host-side HBM pass (useful on mem-bound v5e when the consumer can take it).
    """
    N, H, W, C = x_nhwc.shape
    WC = W * C

    xf = x_nhwc.reshape(N, H, WC)                 # free reshape: fold W,C into lanes
    folded = _fold_params(params, W, compute_dtype)

    NB = batch_block or _pick_batch_block(N, H, W, C, x_nhwc.dtype, compute_dtype)
    assert N % NB == 0, "batch_block must divide N"

    RPI = H + 8
    rows = NB * RPI + 8

    footprint = _vmem_footprint(NB, H, W, C, x_nhwc.dtype, compute_dtype, rows)
    # Footprint + headroom, capped well under v7x's 64 MiB physical VMEM per core.
    vmem_limit = int(min(48 * 1024 * 1024, footprint + 16 * 1024 * 1024))

    wspec = pl.BlockSpec((9, WC), lambda g: (0, 0))
    bspec = pl.BlockSpec((1, WC), lambda g: (0, 0))

    out = pl.pallas_call(
        _make_kernel(NB, H, W, C, compute_dtype),
        out_shape=jax.ShapeDtypeStruct((N, H, 3 * WC), x_nhwc.dtype),
        grid_spec=pltpu.PrefetchScalarGridSpec(
            num_scalar_prefetch=0,
            grid=(N // NB,),
            in_specs=[
                pl.BlockSpec((NB, H, WC), lambda g: (g, 0, 0)),
                bspec, bspec,          # w1 (1,WC), b1 (1,WC)
                wspec, bspec,          # w3a (9,WC), b3a (1,WC)
                wspec, bspec,          # w3b1, b3b1
                wspec, bspec,          # w3b2, b3b2
            ],
            out_specs=pl.BlockSpec((NB, H, 3 * WC), lambda g: (g, 0, 0)),
            scratch_shapes=[
                pltpu.VMEM((rows, WC), compute_dtype),   # row-halo scratch for x
                pltpu.VMEM((rows, WC), compute_dtype),   # row-halo scratch for y1
            ],
        ),
        compiler_params=pltpu.CompilerParams(
            # Every grid step (re)writes all scratch rows it reads, so steps are fully
            # independent -> "parallel" lets v7x shard the grid across both TensorCores.
            dimension_semantics=("parallel",),
            vmem_limit_bytes=vmem_limit,
        ),
    )(xf, *folded)

    if not unfold:
        return out
    # Unfold lanes [branch, w, c] -> NHWC with last dim [x1 chans | x2 chans | x3 chans].
    return out.reshape(N, H, 3, W, C).transpose(0, 1, 3, 2, 4).reshape(N, H, W, 3 * C)


# ----------------------------------------------------------------------------- reference

def init_params(key, C):
    """Deterministic synthetic params. Depthwise weights stored as (kH, kW, C); biases (C,)."""
    ks = jax.random.split(key, 8)
    w1 = 0.1 * jax.random.normal(ks[0], (1, 1, C), jnp.float32)
    b1 = 0.1 * jax.random.normal(ks[1], (C,), jnp.float32)
    w3a = 0.1 * jax.random.normal(ks[2], (3, 3, C), jnp.float32)
    b3a = 0.1 * jax.random.normal(ks[3], (C,), jnp.float32)
    w3b1 = 0.1 * jax.random.normal(ks[4], (3, 3, C), jnp.float32)
    b3b1 = 0.1 * jax.random.normal(ks[5], (C,), jnp.float32)
    w3b2 = 0.1 * jax.random.normal(ks[6], (3, 3, C), jnp.float32)
    b3b2 = 0.1 * jax.random.normal(ks[7], (C,), jnp.float32)
    return (w1, b1, w3a, b3a, w3b1, b3b1, w3b2, b3b2)


def _dw_ref(x, w, b, C):
    """Pure-JAX depthwise conv reference (NHWC, SAME padding)."""
    kh, kw, _ = w.shape
    y = jax.lax.conv_general_dilated(
        x, w.reshape(kh, kw, 1, C),
        window_strides=(1, 1), padding="SAME",
        dimension_numbers=("NHWC", "HWIO", "NHWC"),
        feature_group_count=C)
    return y + b


def reference(x, params):
    C = x.shape[-1]
    w1, b1, w3a, b3a, w3b1, b3b1, w3b2, b3b2 = params
    x1 = _dw_ref(x, w1, b1, C)
    x2 = _dw_ref(x, w3a, b3a, C)
    x3 = _dw_ref(_dw_ref(x, w3b1, b3b1, C), w3b2, b3b2, C)
    return jnp.concatenate([x1, x2, x3], axis=-1)


if __name__ == "__main__":
    key = jax.random.PRNGKey(0)
    kx, kp = jax.random.split(key)

    N, C, H, W = 2, 4, 16, 16
    x = jax.random.normal(kx, (N, H, W, C), jnp.float32)   # NHWC (see layout note above)
    params = init_params(kp, C)

    ref = reference(x, params)

    # f32 I/O + f32 compute (exact path; default, and the right choice on v5e).
    out = jax.block_until_ready(xception_conv(x, params))
    assert out.shape == (N, H, W, 3 * C)
    assert jnp.allclose(out, ref, atol=1e-5, rtol=1e-5)

    # Packed-bf16 compute (v6e/v7x VALU-bound optimization). Tolerance covers bf16
    # multiply/accumulate error through the chained 3x3∘3x3 branch, not just output quant.
    out_bfc = jax.block_until_ready(xception_conv(x, params, compute_dtype=jnp.bfloat16))
    assert jnp.allclose(out_bfc, ref, atol=1e-1, rtol=1e-1)

    # bf16 I/O, f32 compute (halves HBM traffic; main lever on mem-bound v5e). Compare vs.
    # reference on the bf16-rounded input so only output quantization contributes.
    x_bf = x.astype(jnp.bfloat16)
    out_bf = jax.block_until_ready(xception_conv(x_bf, params))
    ref_bf = reference(x_bf.astype(jnp.float32), params)
    assert out_bf.dtype == jnp.bfloat16
    assert jnp.allclose(out_bf.astype(jnp.float32), ref_bf, atol=2e-2, rtol=2e-2)

    print("KERNEL_OK")
</pallas_src>

<mosaic_0001>
module attributes {stable_mosaic.version = 11 : i64} {
  func.func @kernel(%arg0: i32, %arg1: memref<1x16x64xf32, #tpu.memory_space<vmem>>, %arg2: memref<1x64xf32, #tpu.memory_space<vmem>>, %arg3: memref<1x64xf32, #tpu.memory_space<vmem>>, %arg4: memref<9x64xf32, #tpu.memory_space<vmem>>, %arg5: memref<1x64xf32, #tpu.memory_space<vmem>>, %arg6: memref<9x64xf32, #tpu.memory_space<vmem>>, %arg7: memref<1x64xf32, #tpu.memory_space<vmem>>, %arg8: memref<9x64xf32, #tpu.memory_space<vmem>>, %arg9: memref<1x64xf32, #tpu.memory_space<vmem>>, %arg10: memref<1x16x192xf32, #tpu.memory_space<vmem>>, %arg11: memref<32x64xf32, #tpu.memory_space<vmem>>, %arg12: memref<32x64xf32, #tpu.memory_space<vmem>>) attributes {dimension_semantics = [#tpu.dimension_semantics<parallel>], iteration_bounds = array<i64: 2>, scalar_prefetch = 0 : i64, scratch_operands = 2 : i64, tpu.core_type = #tpu.core_type<tc>, window_params = [{transform_indices = @transform_0, window_bounds = array<i64: 1, 16, 64>}, {pipeline_mode = #tpu.pipeline_mode<synchronous>, transform_indices = @transform_1, window_bounds = array<i64: 1, 64>}, {pipeline_mode = #tpu.pipeline_mode<synchronous>, transform_indices = @transform_2, window_bounds = array<i64: 1, 64>}, {pipeline_mode = #tpu.pipeline_mode<synchronous>, transform_indices = @transform_3, window_bounds = array<i64: 9, 64>}, {pipeline_mode = #tpu.pipeline_mode<synchronous>, transform_indices = @transform_4, window_bounds = array<i64: 1, 64>}, {pipeline_mode = #tpu.pipeline_mode<synchronous>, transform_indices = @transform_5, window_bounds = array<i64: 9, 64>}, {pipeline_mode = #tpu.pipeline_mode<synchronous>, transform_indices = @transform_6, window_bounds = array<i64: 1, 64>}, {pipeline_mode = #tpu.pipeline_mode<synchronous>, transform_indices = @transform_7, window_bounds = array<i64: 9, 64>}, {pipeline_mode = #tpu.pipeline_mode<synchronous>, transform_indices = @transform_8, window_bounds = array<i64: 1, 64>}, {transform_indices = @transform_9, window_bounds = array<i64: 1, 16, 192>}]} {
    %c0 = arith.constant 0 : index
    %c0_0 = arith.constant 0 : index
    %0 = vector.load %arg2[%c0, %c0_0] : memref<1x64xf32, #tpu.memory_space<vmem>>, vector<1x64xf32>
    %1 = vector.shape_cast %0 : vector<1x64xf32> to vector<64xf32>
    %c0_1 = arith.constant 0 : index
    %c0_2 = arith.constant 0 : index
    %2 = vector.load %arg3[%c0_1, %c0_2] : memref<1x64xf32, #tpu.memory_space<vmem>>, vector<1x64xf32>
    %3 = vector.shape_cast %2 : vector<1x64xf32> to vector<64xf32>
    %c0_3 = arith.constant 0 : index
    %c0_4 = arith.constant 0 : index
    %4 = vector.load %arg5[%c0_3, %c0_4] : memref<1x64xf32, #tpu.memory_space<vmem>>, vector<1x64xf32>
    %5 = vector.shape_cast %4 : vector<1x64xf32> to vector<64xf32>
    %c0_5 = arith.constant 0 : index
    %c0_6 = arith.constant 0 : index
    %6 = vector.load %arg7[%c0_5, %c0_6] : memref<1x64xf32, #tpu.memory_space<vmem>>, vector<1x64xf32>
    %7 = vector.shape_cast %6 : vector<1x64xf32> to vector<64xf32>
    %c0_7 = arith.constant 0 : index
    %c0_8 = arith.constant 0 : index
    %8 = vector.load %arg9[%c0_7, %c0_8] : memref<1x64xf32, #tpu.memory_space<vmem>>, vector<1x64xf32>
    %9 = vector.shape_cast %8 : vector<1x64xf32> to vector<64xf32>
    %c0_9 = arith.constant 0 : index
    %c0_10 = arith.constant 0 : index
    %10 = vector.load %arg4[%c0_9, %c0_10] : memref<9x64xf32, #tpu.memory_space<vmem>>, vector<1x64xf32>
    %11 = vector.shape_cast %10 : vector<1x64xf32> to vector<64xf32>
    %c1 = arith.constant 1 : index
    %c0_11 = arith.constant 0 : index
    %12 = vector.load %arg4[%c1, %c0_11] : memref<9x64xf32, #tpu.memory_space<vmem>>, vector<1x64xf32>
    %13 = vector.shape_cast %12 : vector<1x64xf32> to vector<64xf32>
    %c2 = arith.constant 2 : index
    %c0_12 = arith.constant 0 : index
    %14 = vector.load %arg4[%c2, %c0_12] : memref<9x64xf32, #tpu.memory_space<vmem>>, vector<1x64xf32>
    %15 = vector.shape_cast %14 : vector<1x64xf32> to vector<64xf32>
    %c3 = arith.constant 3 : index
    %c0_13 = arith.constant 0 : index
    %16 = vector.load %arg4[%c3, %c0_13] : memref<9x64xf32, #tpu.memory_space<vmem>>, vector<1x64xf32>
    %17 = vector.shape_cast %16 : vector<1x64xf32> to vector<64xf32>
    %c4 = arith.constant 4 : index
    %c0_14 = arith.constant 0 : index
    %18 = vector.load %arg4[%c4, %c0_14] : memref<9x64xf32, #tpu.memory_space<vmem>>, vector<1x64xf32>
    %19 = vector.shape_cast %18 : vector<1x64xf32> to vector<64xf32>
    %c5 = arith.constant 5 : index
    %c0_15 = arith.constant 0 : index
    %20 = vector.load %arg4[%c5, %c0_15] : memref<9x64xf32, #tpu.memory_space<vmem>>, vector<1x64xf32>
    %21 = vector.shape_cast %20 : vector<1x64xf32> to vector<64xf32>
    %c6 = arith.constant 6 : index
    %c0_16 = arith.constant 0 : index
    %22 = vector.load %arg4[%c6, %c0_16] : memref<9x64xf32, #tpu.memory_space<vmem>>, vector<1x64xf32>
    %23 = vector.shape_cast %22 : vector<1x64xf32> to vector<64xf32>
    %c7 = arith.constant 7 : index
    %c0_17 = arith.constant 0 : index
    %24 = vector.load %arg4[%c7, %c0_17] : memref<9x64xf32, #tpu.memory_space<vmem>>, vector<1x64xf32>
    %25 = vector.shape_cast %24 : vector<1x64xf32> to vector<64xf32>
    %c8 = arith.constant 8 : index
    %c0_18 = arith.constant 0 : index
    %26 = vector.load %arg4[%c8, %c0_18] : memref<9x64xf32, #tpu.memory_space<vmem>>, vector<1x64xf32>
    %27 = vector.shape_cast %26 : vector<1x64xf32> to vector<64xf32>
    %c0_19 = arith.constant 0 : index
    %c0_20 = arith.constant 0 : index
    %28 = vector.load %arg6[%c0_19, %c0_20] : memref<9x64xf32, #tpu.memory_space<vmem>>, vector<1x64xf32>
    %29 = vector.shape_cast %28 : vector<1x64xf32> to vector<64xf32>
    %c1_21 = arith.constant 1 : index
    %c0_22 = arith.constant 0 : index
    %30 = vector.load %arg6[%c1_21, %c0_22] : memref<9x64xf32, #tpu.memory_space<vmem>>, vector<1x64xf32>
    %31 = vector.shape_cast %30 : vector<1x64xf32> to vector<64xf32>
    %c2_23 = arith.constant 2 : index
    %c0_24 = arith.constant 0 : index
    %32 = vector.load %arg6[%c2_23, %c0_24] : memref<9x64xf32, #tpu.memory_space<vmem>>, vector<1x64xf32>
    %33 = vector.shape_cast %32 : vector<1x64xf32> to vector<64xf32>
    %c3_25 = arith.constant 3 : index
    %c0_26 = arith.constant 0 : index
    %34 = vector.load %arg6[%c3_25, %c0_26] : memref<9x64xf32, #tpu.memory_space<vmem>>, vector<1x64xf32>
    %35 = vector.shape_cast %34 : vector<1x64xf32> to vector<64xf32>
    %c4_27 = arith.constant 4 : index
    %c0_28 = arith.constant 0 : index
    %36 = vector.load %arg6[%c4_27, %c0_28] : memref<9x64xf32, #tpu.memory_space<vmem>>, vector<1x64xf32>
    %37 = vector.shape_cast %36 : vector<1x64xf32> to vector<64xf32>
    %c5_29 = arith.constant 5 : index
    %c0_30 = arith.constant 0 : index
    %38 = vector.load %arg6[%c5_29, %c0_30] : memref<9x64xf32, #tpu.memory_space<vmem>>, vector<1x64xf32>
    %39 = vector.shape_cast %38 : vector<1x64xf32> to vector<64xf32>
    %c6_31 = arith.constant 6 : index
    %c0_32 = arith.constant 0 : index
    %40 = vector.load %arg6[%c6_31, %c0_32] : memref<9x64xf32, #tpu.memory_space<vmem>>, vector<1x64xf32>
    %41 = vector.shape_cast %40 : vector<1x64xf32> to vector<64xf32>
    %c7_33 = arith.constant 7 : index
    %c0_34 = arith.constant 0 : index
    %42 = vector.load %arg6[%c7_33, %c0_34] : memref<9x64xf32, #tpu.memory_space<vmem>>, vector<1x64xf32>
    %43 = vector.shape_cast %42 : vector<1x64xf32> to vector<64xf32>
    %c8_35 = arith.constant 8 : index
    %c0_36 = arith.constant 0 : index
    %44 = vector.load %arg6[%c8_35, %c0_36] : memref<9x64xf32, #tpu.memory_space<vmem>>, vector<1x64xf32>
    %45 = vector.shape_cast %44 : vector<1x64xf32> to vector<64xf32>
    %c0_37 = arith.constant 0 : index
    %c0_38 = arith.constant 0 : index
    %46 = vector.load %arg8[%c0_37, %c0_38] : memref<9x64xf32, #tpu.memory_space<vmem>>, vector<1x64xf32>
    %47 = vector.shape_cast %46 : vector<1x64xf32> to vector<64xf32>
    %c1_39 = arith.constant 1 : index
    %c0_40 = arith.constant 0 : index
    %48 = vector.load %arg8[%c1_39, %c0_40] : memref<9x64xf32, #tpu.memory_space<vmem>>, vector<1x64xf32>
    %49 = vector.shape_cast %48 : vector<1x64xf32> to vector<64xf32>
    %c2_41 = arith.constant 2 : index
    %c0_42 = arith.constant 0 : index
    %50 = vector.load %arg8[%c2_41, %c0_42] : memref<9x64xf32, #tpu.memory_space<vmem>>, vector<1x64xf32>
    %51 = vector.shape_cast %50 : vector<1x64xf32> to vector<64xf32>
    %c3_43 = arith.constant 3 : index
    %c0_44 = arith.constant 0 : index
    %52 = vector.load %arg8[%c3_43, %c0_44] : memref<9x64xf32, #tpu.memory_space<vmem>>, vector<1x64xf32>
    %53 = vector.shape_cast %52 : vector<1x64xf32> to vector<64xf32>
    %c4_45 = arith.constant 4 : index
    %c0_46 = arith.constant 0 : index
    %54 = vector.load %arg8[%c4_45, %c0_46] : memref<9x64xf32, #tpu.memory_space<vmem>>, vector<1x64xf32>
    %55 = vector.shape_cast %54 : vector<1x64xf32> to vector<64xf32>
    %c5_47 = arith.constant 5 : index
    %c0_48 = arith.constant 0 : index
    %56 = vector.load %arg8[%c5_47, %c0_48] : memref<9x64xf32, #tpu.memory_space<vmem>>, vector<1x64xf32>
    %57 = vector.shape_cast %56 : vector<1x64xf32> to vector<64xf32>
    %c6_49 = arith.constant 6 : index
    %c0_50 = arith.constant 0 : index
    %58 = vector.load %arg8[%c6_49, %c0_50] : memref<9x64xf32, #tpu.memory_space<vmem>>, vector<1x64xf32>
    %59 = vector.shape_cast %58 : vector<1x64xf32> to vector<64xf32>
    %c7_51 = arith.constant 7 : index
    %c0_52 = arith.constant 0 : index
    %60 = vector.load %arg8[%c7_51, %c0_52] : memref<9x64xf32, #tpu.memory_space<vmem>>, vector<1x64xf32>
    %61 = vector.shape_cast %60 : vector<1x64xf32> to vector<64xf32>
    %c8_53 = arith.constant 8 : index
    %c0_54 = arith.constant 0 : index
    %62 = vector.load %arg8[%c8_53, %c0_54] : memref<9x64xf32, #tpu.memory_space<vmem>>, vector<1x64xf32>
    %63 = vector.shape_cast %62 : vector<1x64xf32> to vector<64xf32>
    %cst = arith.constant 0.000000e+00 : f32
    %64 = vector.broadcast %cst : f32 to vector<1x64xf32>
    %cst_55 = arith.constant 0.000000e+00 : f32
    %65 = vector.broadcast %cst_55 : f32 to vector<16x4xf32>
    %c0_56 = arith.constant 0 : index
    %c0_57 = arith.constant 0 : index
    %c0_58 = arith.constant 0 : index
    %66 = vector.load %arg1[%c0_56, %c0_57, %c0_58] : memref<1x16x64xf32, #tpu.memory_space<vmem>>, vector<1x16x64xf32>
    %67 = vector.shape_cast %66 : vector<1x16x64xf32> to vector<16x64xf32>
    %68 = vector.shape_cast %1 : vector<64xf32> to vector<1x64xf32>
    %69 = vector.broadcast %68 : vector<1x64xf32> to vector<16x64xf32>
    %70 = arith.mulf %67, %69 : vector<16x64xf32>
    %71 = vector.shape_cast %3 : vector<64xf32> to vector<1x64xf32>
    %72 = vector.broadcast %71 : vector<1x64xf32> to vector<16x64xf32>
    %73 = arith.addf %70, %72 : vector<16x64xf32>
    %c7_59 = arith.constant 7 : index
    %c0_60 = arith.constant 0 : index
    %74 = vector.load %arg11[%c7_59, %c0_60] : memref<32x64xf32, #tpu.memory_space<vmem>>, vector<1x64xf32>
    tpu.vector_store %arg11[%c7_59, %c0_60], %64 {strides = array<i32>} : memref<32x64xf32, #tpu.memory_space<vmem>>, vector<1x64xf32>,
    %c8_61 = arith.constant 8 : index
    %c0_62 = arith.constant 0 : index
    %75 = vector.load %arg11[%c8_61, %c0_62] : memref<32x64xf32, #tpu.memory_space<vmem>>, vector<16x64xf32>
    tpu.vector_store %arg11[%c8_61, %c0_62], %67 {strides = array<i32>} : memref<32x64xf32, #tpu.memory_space<vmem>>, vector<16x64xf32>,
    %c24 = arith.constant 24 : index
    %c0_63 = arith.constant 0 : index
    %76 = vector.load %arg11[%c24, %c0_63] : memref<32x64xf32, #tpu.memory_space<vmem>>, vector<1x64xf32>
    tpu.vector_store %arg11[%c24, %c0_63], %64 {strides = array<i32>} : memref<32x64xf32, #tpu.memory_space<vmem>>, vector<1x64xf32>,
    %c7_64 = arith.constant 7 : index
    %c0_65 = arith.constant 0 : index
    %77 = vector.load %arg11[%c7_64, %c0_65] : memref<32x64xf32, #tpu.memory_space<vmem>>, vector<16x64xf32>
    %c9 = arith.constant 9 : index
    %c0_66 = arith.constant 0 : index
    %78 = vector.load %arg11[%c9, %c0_66] : memref<32x64xf32, #tpu.memory_space<vmem>>, vector<16x64xf32>
    %79 = vector.extract_strided_slice %77 {offsets = [0, 0], sizes = [16, 60], strides = [1, 1]} : vector<16x64xf32> to vector<16x60xf32>
    %80 = tpu.concatenate %65, %79 in 1 : vector<16x4xf32>, vector<16x60xf32> -> vector<16x64xf32>
    %81 = vector.extract_strided_slice %77 {offsets = [0, 4], sizes = [16, 60], strides = [1, 1]} : vector<16x64xf32> to vector<16x60xf32>
    %82 = tpu.concatenate %81, %65 in 1 : vector<16x60xf32>, vector<16x4xf32> -> vector<16x64xf32>
    %83 = vector.shape_cast %11 : vector<64xf32> to vector<1x64xf32>
    %84 = vector.broadcast %83 : vector<1x64xf32> to vector<16x64xf32>
    %85 = arith.mulf %80, %84 : vector<16x64xf32>
    %86 = vector.shape_cast %29 : vector<64xf32> to vector<1x64xf32>
    %87 = vector.broadcast %86 : vector<1x64xf32> to vector<16x64xf32>
    %88 = arith.mulf %80, %87 : vector<16x64xf32>
    %89 = vector.shape_cast %13 : vector<64xf32> to vector<1x64xf32>
    %90 = vector.broadcast %89 : vector<1x64xf32> to vector<16x64xf32>
    %91 = arith.mulf %77, %90 : vector<16x64xf32>
    %92 = vector.shape_cast %31 : vector<64xf32> to vector<1x64xf32>
    %93 = vector.broadcast %92 : vector<1x64xf32> to vector<16x64xf32>
    %94 = arith.mulf %77, %93 : vector<16x64xf32>
    %95 = arith.addf %85, %91 : vector<16x64xf32>
    %96 = arith.addf %88, %94 : vector<16x64xf32>
    %97 = vector.shape_cast %15 : vector<64xf32> to vector<1x64xf32>
    %98 = vector.broadcast %97 : vector<1x64xf32> to vector<16x64xf32>
    %99 = arith.mulf %82, %98 : vector<16x64xf32>
    %100 = vector.shape_cast %33 : vector<64xf32> to vector<1x64xf32>
    %101 = vector.broadcast %100 : vector<1x64xf32> to vector<16x64xf32>
    %102 = arith.mulf %82, %101 : vector<16x64xf32>
    %103 = arith.addf %95, %99 : vector<16x64xf32>
    %104 = arith.addf %96, %102 : vector<16x64xf32>
    %105 = vector.extract_strided_slice %67 {offsets = [0, 0], sizes = [16, 60], strides = [1, 1]} : vector<16x64xf32> to vector<16x60xf32>
    %106 = tpu.concatenate %65, %105 in 1 : vector<16x4xf32>, vector<16x60xf32> -> vector<16x64xf32>
    %107 = vector.extract_strided_slice %67 {offsets = [0, 4], sizes = [16, 60], strides = [1, 1]} : vector<16x64xf32> to vector<16x60xf32>
    %108 = tpu.concatenate %107, %65 in 1 : vector<16x60xf32>, vector<16x4xf32> -> vector<16x64xf32>
    %109 = vector.shape_cast %17 : vector<64xf32> to vector<1x64xf32>
    %110 = vector.broadcast %109 : vector<1x64xf32> to vector<16x64xf32>
    %111 = arith.mulf %106, %110 : vector<16x64xf32>
    %112 = vector.shape_cast %35 : vector<64xf32> to vector<1x64xf32>
    %113 = vector.broadcast %112 : vector<1x64xf32> to vector<16x64xf32>
    %114 = arith.mulf %106, %113 : vector<16x64xf32>
    %115 = arith.addf %103, %111 : vector<16x64xf32>
    %116 = arith.addf %104, %114 : vector<16x64xf32>
    %117 = vector.shape_cast %19 : vector<64xf32> to vector<1x64xf32>
    %118 = vector.broadcast %117 : vector<1x64xf32> to vector<16x64xf32>
    %119 = arith.mulf %67, %118 : vector<16x64xf32>
    %120 = vector.shape_cast %37 : vector<64xf32> to vector<1x64xf32>
    %121 = vector.broadcast %120 : vector<1x64xf32> to vector<16x64xf32>
    %122 = arith.mulf %67, %121 : vector<16x64xf32>
    %123 = arith.addf %115, %119 : vector<16x64xf32>
    %124 = arith.addf %116, %122 : vector<16x64xf32>
    %125 = vector.shape_cast %21 : vector<64xf32> to vector<1x64xf32>
    %126 = vector.broadcast %125 : vector<1x64xf32> to vector<16x64xf32>
    %127 = arith.mulf %108, %126 : vector<16x64xf32>
    %128 = vector.shape_cast %39 : vector<64xf32> to vector<1x64xf32>
    %129 = vector.broadcast %128 : vector<1x64xf32> to vector<16x64xf32>
    %130 = arith.mulf %108, %129 : vector<16x64xf32>
    %131 = arith.addf %123, %127 : vector<16x64xf32>
    %132 = arith.addf %124, %130 : vector<16x64xf32>
    %133 = vector.extract_strided_slice %78 {offsets = [0, 0], sizes = [16, 60], strides = [1, 1]} : vector<16x64xf32> to vector<16x60xf32>
    %134 = tpu.concatenate %65, %133 in 1 : vector<16x4xf32>, vector<16x60xf32> -> vector<16x64xf32>
    %135 = vector.extract_strided_slice %78 {offsets = [0, 4], sizes = [16, 60], strides = [1, 1]} : vector<16x64xf32> to vector<16x60xf32>
    %136 = tpu.concatenate %135, %65 in 1 : vector<16x60xf32>, vector<16x4xf32> -> vector<16x64xf32>
    %137 = vector.shape_cast %23 : vector<64xf32> to vector<1x64xf32>
    %138 = vector.broadcast %137 : vector<1x64xf32> to vector<16x64xf32>
    %139 = arith.mulf %134, %138 : vector<16x64xf32>
    %140 = vector.shape_cast %41 : vector<64xf32> to vector<1x64xf32>
    %141 = vector.broadcast %140 : vector<1x64xf32> to vector<16x64xf32>
    %142 = arith.mulf %134, %141 : vector<16x64xf32>
    %143 = arith.addf %131, %139 : vector<16x64xf32>
    %144 = arith.addf %132, %142 : vector<16x64xf32>
    %145 = vector.shape_cast %25 : vector<64xf32> to vector<1x64xf32>
    %146 = vector.broadcast %145 : vector<1x64xf32> to vector<16x64xf32>
    %147 = arith.mulf %78, %146 : vector<16x64xf32>
    %148 = vector.shape_cast %43 : vector<64xf32> to vector<1x64xf32>
    %149 = vector.broadcast %148 : vector<1x64xf32> to vector<16x64xf32>
    %150 = arith.mulf %78, %149 : vector<16x64xf32>
    %151 = arith.addf %143, %147 : vector<16x64xf32>
    %152 = arith.addf %144, %150 : vector<16x64xf32>
    %153 = vector.shape_cast %27 : vector<64xf32> to vector<1x64xf32>
    %154 = vector.broadcast %153 : vector<1x64xf32> to vector<16x64xf32>
    %155 = arith.mulf %136, %154 : vector<16x64xf32>
    %156 = vector.shape_cast %45 : vector<64xf32> to vector<1x64xf32>
    %157 = vector.broadcast %156 : vector<1x64xf32> to vector<16x64xf32>
    %158 = arith.mulf %136, %157 : vector<16x64xf32>
    %159 = arith.addf %151, %155 : vector<16x64xf32>
    %160 = arith.addf %152, %158 : vector<16x64xf32>
    %161 = vector.shape_cast %5 : vector<64xf32> to vector<1x64xf32>
    %162 = vector.broadcast %161 : vector<1x64xf32> to vector<16x64xf32>
    %163 = arith.addf %159, %162 : vector<16x64xf32>
    %164 = vector.shape_cast %7 : vector<64xf32> to vector<1x64xf32>
    %165 = vector.broadcast %164 : vector<1x64xf32> to vector<16x64xf32>
    %166 = arith.addf %160, %165 : vector<16x64xf32>
    %c7_67 = arith.constant 7 : index
    %c0_68 = arith.constant 0 : index
    %167 = vector.load %arg12[%c7_67, %c0_68] : memref<32x64xf32, #tpu.memory_space<vmem>>, vector<1x64xf32>
    tpu.vector_store %arg12[%c7_67, %c0_68], %64 {strides = array<i32>} : memref<32x64xf32, #tpu.memory_space<vmem>>, vector<1x64xf32>,
    %c8_69 = arith.constant 8 : index
    %c0_70 = arith.constant 0 : index
    %168 = vector.load %arg12[%c8_69, %c0_70] : memref<32x64xf32, #tpu.memory_space<vmem>>, vector<16x64xf32>
    tpu.vector_store %arg12[%c8_69, %c0_70], %166 {strides = array<i32>} : memref<32x64xf32, #tpu.memory_space<vmem>>, vector<16x64xf32>,
    %c24_71 = arith.constant 24 : index
    %c0_72 = arith.constant 0 : index
    %169 = vector.load %arg12[%c24_71, %c0_72] : memref<32x64xf32, #tpu.memory_space<vmem>>, vector<1x64xf32>
    tpu.vector_store %arg12[%c24_71, %c0_72], %64 {strides = array<i32>} : memref<32x64xf32, #tpu.memory_space<vmem>>, vector<1x64xf32>,
    %c7_73 = arith.constant 7 : index
    %c0_74 = arith.constant 0 : index
    %170 = vector.load %arg12[%c7_73, %c0_74] : memref<32x64xf32, #tpu.memory_space<vmem>>, vector<16x64xf32>
    %c9_75 = arith.constant 9 : index
    %c0_76 = arith.constant 0 : index
    %171 = vector.load %arg12[%c9_75, %c0_76] : memref<32x64xf32, #tpu.memory_space<vmem>>, vector<16x64xf32>
    %172 = vector.extract_strided_slice %170 {offsets = [0, 0], sizes = [16, 60], strides = [1, 1]} : vector<16x64xf32> to vector<16x60xf32>
    %173 = tpu.concatenate %65, %172 in 1 : vector<16x4xf32>, vector<16x60xf32> -> vector<16x64xf32>
    %174 = vector.extract_strided_slice %170 {offsets = [0, 4], sizes = [16, 60], strides = [1, 1]} : vector<16x64xf32> to vector<16x60xf32>
    %175 = tpu.concatenate %174, %65 in 1 : vector<16x60xf32>, vector<16x4xf32> -> vector<16x64xf32>
    %176 = vector.shape_cast %47 : vector<64xf32> to vector<1x64xf32>
    %177 = vector.broadcast %176 : vector<1x64xf32> to vector<16x64xf32>
    %178 = arith.mulf %173, %177 : vector<16x64xf32>
    %179 = vector.shape_cast %49 : vector<64xf32> to vector<1x64xf32>
    %180 = vector.broadcast %179 : vector<1x64xf32> to vector<16x64xf32>
    %181 = arith.mulf %170, %180 : vector<16x64xf32>
    %182 = arith.addf %178, %181 : vector<16x64xf32>
    %183 = vector.shape_cast %51 : vector<64xf32> to vector<1x64xf32>
    %184 = vector.broadcast %183 : vector<1x64xf32> to vector<16x64xf32>
    %185 = arith.mulf %175, %184 : vector<16x64xf32>
    %186 = arith.addf %182, %185 : vector<16x64xf32>
    %187 = vector.extract_strided_slice %166 {offsets = [0, 0], sizes = [16, 60], strides = [1, 1]} : vector<16x64xf32> to vector<16x60xf32>
    %188 = tpu.concatenate %65, %187 in 1 : vector<16x4xf32>, vector<16x60xf32> -> vector<16x64xf32>
    %189 = vector.extract_strided_slice %166 {offsets = [0, 4], sizes = [16, 60], strides = [1, 1]} : vector<16x64xf32> to vector<16x60xf32>
    %190 = tpu.concatenate %189, %65 in 1 : vector<16x60xf32>, vector<16x4xf32> -> vector<16x64xf32>
    %191 = vector.shape_cast %53 : vector<64xf32> to vector<1x64xf32>
    %192 = vector.broadcast %191 : vector<1x64xf32> to vector<16x64xf32>
    %193 = arith.mulf %188, %192 : vector<16x64xf32>
    %194 = arith.addf %186, %193 : vector<16x64xf32>
    %195 = vector.shape_cast %55 : vector<64xf32> to vector<1x64xf32>
    %196 = vector.broadcast %195 : vector<1x64xf32> to vector<16x64xf32>
    %197 = arith.mulf %166, %196 : vector<16x64xf32>
    %198 = arith.addf %194, %197 : vector<16x64xf32>
    %199 = vector.shape_cast %57 : vector<64xf32> to vector<1x64xf32>
    %200 = vector.broadcast %199 : vector<1x64xf32> to vector<16x64xf32>
    %201 = arith.mulf %190, %200 : vector<16x64xf32>
    %202 = arith.addf %198, %201 : vector<16x64xf32>
    %203 = vector.extract_strided_slice %171 {offsets = [0, 0], sizes = [16, 60], strides = [1, 1]} : vector<16x64xf32> to vector<16x60xf32>
    %204 = tpu.concatenate %65, %203 in 1 : vector<16x4xf32>, vector<16x60xf32> -> vector<16x64xf32>
    %205 = vector.extract_strided_slice %171 {offsets = [0, 4], sizes = [16, 60], strides = [1, 1]} : vector<16x64xf32> to vector<16x60xf32>
    %206 = tpu.concatenate %205, %65 in 1 : vector<16x60xf32>, vector<16x4xf32> -> vector<16x64xf32>
    %207 = vector.shape_cast %59 : vector<64xf32> to vector<1x64xf32>
    %208 = vector.broadcast %207 : vector<1x64xf32> to vector<16x64xf32>
    %209 = arith.mulf %204, %208 : vector<16x64xf32>
    %210 = arith.addf %202, %209 : vector<16x64xf32>
    %211 = vector.shape_cast %61 : vector<64xf32> to vector<1x64xf32>
    %212 = vector.broadcast %211 : vector<1x64xf32> to vector<16x64xf32>
    %213 = arith.mulf %171, %212 : vector<16x64xf32>
    %214 = arith.addf %210, %213 : vector<16x64xf32>
    %215 = vector.shape_cast %63 : vector<64xf32> to vector<1x64xf32>
    %216 = vector.broadcast %215 : vector<1x64xf32> to vector<16x64xf32>
    %217 = arith.mulf %206, %216 : vector<16x64xf32>
    %218 = arith.addf %214, %217 : vector<16x64xf32>
    %219 = vector.shape_cast %9 : vector<64xf32> to vector<1x64xf32>
    %220 = vector.broadcast %219 : vector<1x64xf32> to vector<16x64xf32>
    %221 = arith.addf %218, %220 : vector<16x64xf32>
    %222 = tpu.concatenate %73, %163, %221 in 1 : vector<16x64xf32>, vector<16x64xf32>, vector<16x64xf32> -> vector<16x192xf32>
    %c0_77 = arith.constant 0 : index
    %c0_78 = arith.constant 0 : index
    %c0_79 = arith.constant 0 : index
    %223 = vector.load %arg10[%c0_77, %c0_78, %c0_79] : memref<1x16x192xf32, #tpu.memory_space<vmem>>, vector<1x16x192xf32>
    %224 = vector.shape_cast %223 : vector<1x16x192xf32> to vector<16x192xf32>
    %225 = vector.shape_cast %222 : vector<16x192xf32> to vector<1x16x192xf32>
    tpu.vector_store %arg10[%c0_77, %c0_78, %c0_79], %225 {strides = array<i32>} : memref<1x16x192xf32, #tpu.memory_space<vmem>>, vector<1x16x192xf32>,
    return
  }
  func.func @transform_0(%arg0: i32) -> (i32, i32, i32) {
    %c0_i32 = arith.constant 0 : i32
    %c0_i32_0 = arith.constant 0 : i32
    %c0_i32_1 = arith.constant 0 : i32
    return %arg0, %c0_i32, %c0_i32_0 : i32, i32, i32
  }
  func.func @transform_1(%arg0: i32) -> (i32, i32) {
    %c0_i32 = arith.constant 0 : i32
    %c0_i32_0 = arith.constant 0 : i32
    %c0_i32_1 = arith.constant 0 : i32
    return %c0_i32, %c0_i32_0 : i32, i32
  }
  func.func @transform_2(%arg0: i32) -> (i32, i32) {
    %c0_i32 = arith.constant 0 : i32
    %c0_i32_0 = arith.constant 0 : i32
    %c0_i32_1 = arith.constant 0 : i32
    return %c0_i32, %c0_i32_0 : i32, i32
  }
  func.func @transform_3(%arg0: i32) -> (i32, i32) {
    %c0_i32 = arith.constant 0 : i32
    %c0_i32_0 = arith.constant 0 : i32
    %c0_i32_1 = arith.constant 0 : i32
    return %c0_i32, %c0_i32_0 : i32, i32
  }
  func.func @transform_4(%arg0: i32) -> (i32, i32) {
    %c0_i32 = arith.constant 0 : i32
    %c0_i32_0 = arith.constant 0 : i32
    %c0_i32_1 = arith.constant 0 : i32
    return %c0_i32, %c0_i32_0 : i32, i32
  }
  func.func @transform_5(%arg0: i32) -> (i32, i32) {
    %c0_i32 = arith.constant 0 : i32
    %c0_i32_0 = arith.constant 0 : i32
    %c0_i32_1 = arith.constant 0 : i32
    return %c0_i32, %c0_i32_0 : i32, i32
  }
  func.func @transform_6(%arg0: i32) -> (i32, i32) {
    %c0_i32 = arith.constant 0 : i32
    %c0_i32_0 = arith.constant 0 : i32
    %c0_i32_1 = arith.constant 0 : i32
    return %c0_i32, %c0_i32_0 : i32, i32
  }
  func.func @transform_7(%arg0: i32) -> (i32, i32) {
    %c0_i32 = arith.constant 0 : i32
    %c0_i32_0 = arith.constant 0 : i32
    %c0_i32_1 = arith.constant 0 : i32
    return %c0_i32, %c0_i32_0 : i32, i32
  }
  func.func @transform_8(%arg0: i32) -> (i32, i32) {
    %c0_i32 = arith.constant 0 : i32
    %c0_i32_0 = arith.constant 0 : i32
    %c0_i32_1 = arith.constant 0 : i32
    return %c0_i32, %c0_i32_0 : i32, i32
  }
  func.func @transform_9(%arg0: i32) -> (i32, i32, i32) {
    %c0_i32 = arith.constant 0 : i32
    %c0_i32_0 = arith.constant 0 : i32
    %c0_i32_1 = arith.constant 0 : i32
    return %arg0, %c0_i32, %c0_i32_0 : i32, i32, i32
  }
}

</mosaic_0001>

<bundles_post_ra>
// kernel: tpu_custom_call.1
= control target key start
LH: loop header
LB: loop body
LE: loop exit
PB: predicated region body
PF: predicated region fallthrough
CT: control target
= control target key end

     0   :  { %s1664_s0 = inlined_call_operand.hbm [shape: f32[2,16,64], index: 0, kind: input, shape index: {}]   ;;  %s1665_s1 = inlined_call_operand.hbm [shape: f32[1,64], index: 1, kind: input, shape index: {}]   ;;  %s1666_s2 = inlined_call_operand.vmem [shape: f32[1,64], index: 2, kind: input, shape index: {}]   ;;  %s1667_s3 = inlined_call_operand.hbm [shape: f32[9,64], index: 3, kind: input, shape index: {}]   ;;  %s1668_s4 = inlined_call_operand.vmem [shape: f32[1,64], index: 4, kind: input, shape index: {}]   ;;  %s1669_s5 = inlined_call_operand.hbm [shape: f32[9,64], index: 5, kind: input, shape index: {}]   ;;  %s1670_s6 = inlined_call_operand.vmem [shape: f32[1,64], index: 6, kind: input, shape index: {}]   ;;  %s1671_s7 = inlined_call_operand.hbm [shape: f32[9,64], index: 7, kind: input, shape index: {}]   ;;  %s1672_s8 = inlined_call_operand.vmem [shape: f32[1,64], index: 8, kind: input, shape index: {}]   ;;  %s1673_s9 = inlined_call_operand.hbm [shape: f32[2,16,192], index: 9, kind: output, shape index: {}]  }
   0x1   :  { %1676 = sst [smem:[#allocation18_spill]] %s1665_s1 }
   0x2   :  { %1677 = sst [smem:[#allocation19_spill]] %s1667_s3 }
   0x3   :  { %1678 = sst [smem:[#allocation20_spill]] %s1669_s5 }
   0x4   :  { %14 = vsyncpa [#allocation5], 0 }
   0x5   :  { %16 = vsyncpa [#allocation5 + $0x1], 0 }
   0x6   :  { %17 = vsyncpa [#allocation8], 0 }
   0x7   :  { %18 = vsyncpa [#allocation11], 0 }
   0x8   :  { %19 = vsyncpa [#allocation6], 0 }
   0x9   :  { %21 = vsyncpa [#allocation6 + $0x1], 0  ;;  %s1313_s30 = smov 0   ;;  %s1315_s10 = smov 0  }
   0xa   :  { %s1317_s11 = smov 0   ;;  %s1319_s12 = smov 0  }
   0xb LB: > { %s1334_s13 = sadd.s32 4294967295, %s1249_s12   ;;  %s874_s14 = sadd.s32 4294967294, %s1249_s12   ;;  %s1249_s12 = sphi %s1319_s12, %s1694_s12   ;;  %s1245_s11 = sphi %s1317_s11, %s1693_s11   ;;  %s1241_s10 = sphi %s1315_s10, %s1692_s10   ;;  %s1237_s30 = sphi %s1313_s30, %s1691_s30  }
   0xc   : > { %p47_p0 = scmp.ne.s32.totalorder %s1241_s10, %s1237_s30  ;;  %p48_p1 = scmp.eq.s32.totalorder %s1334_s13, 0 }
   0xd   : > { %p239_p2 = scmp.eq.s32.totalorder %s1334_s13, 1  ;;  %p245_p3 = scmp.eq.s32.totalorder %s874_s14, 1 }
   0xe   : > { %p1343_p4 = por %p48_p1, %p47_p0  ;;  %p875_p5 = scmp.ge.s32.totalorder %s1249_s12, 1 }
   0xf   : > { %p1348_p6 = por %p245_p3, %p47_p0  ;;  %p252_p7 = scmp.lt.s32.totalorder %s1249_s12, 3 }
  0x10   : > { %s1681_s1 = sld [smem:[#allocation18_spill]]  ;;  %s1251_s21 = smov [#allocation7]  }
  0x11   : > { %p1356_p8 = pnand %p875_p5, %p252_p7  ;;  %s266_s22 = sshll.u32 %s1251_s21, 4  ;;  %s267_s22 = int_to_ptr.vmem [resolvable:$true] %s266_s22 }
  0x12   : > { %s1684_s5 = sld [smem:[#allocation20_spill]]  ;;  %s1252_s27 = smov [#allocation10]  }
  0x13   : > { %p918_p10 = pneg %p1356_p8  ;;  %s297_s28 = sshll.u32 %s1252_s27, 4  ;;  %s298_s28 = int_to_ptr.vmem [resolvable:$true] %s297_s28 }
  0x14   : > { %s1685_s3 = sld [smem:[#allocation19_spill]]  ;;  %s1674_s18 = smov 128  }
  0x15   : > { %p1365_p11 = pnand %p918_p10, %p48_p1  ;;  %s1675_s21 = smov 8  }
  0x16   : > { %s264_s19 = sshll.u32 %s1681_s1, 4  ;;  %s312_s24 = sshll.u32 %s1671_s7, 4  ;;  %s265_s19 = int_to_ptr.hbm [resolvable:$true] %s264_s19  ;;  %s313_s24 = int_to_ptr.hbm [resolvable:$true] %s312_s24 }
  0x17   : > { %921 = dma.hbm_to_vmem [thread:$0]  (!%p1365_p11), %s265_s19, 16, %s267_s22, [#allocation8]  }
  0x18   : > { %s295_s26 = sshll.u32 %s1684_s5, 4  ;;  %s1255_s25 = smov [#allocation9]   ;;  %s296_s26 = int_to_ptr.hbm [resolvable:$true] %s295_s26 }
  0x19   : > { %927 = dma.hbm_to_vmem [thread:$0]  (!%p1365_p11), %s296_s26, 256, %s298_s28, [#allocation11], %s1674_s18, %s1674_s18, %s1675_s21  }
  0x1a   : > { %s278_s17 = sshll.u32 %s1685_s3, 4  ;;  %s280_s27 = sshll.u32 %s1255_s25, 4  ;;  %s279_s17 = int_to_ptr.hbm [resolvable:$true] %s278_s17  ;;  %s281_s27 = int_to_ptr.vmem [resolvable:$true] %s280_s27 }
  0x1b   : > { %924 = dma.hbm_to_vmem [thread:$0]  (!%p1365_p11), %s279_s17, 256, %s281_s27, [#allocation8], %s1674_s18, %s1674_s18, %s1675_s21  }
  0x1c   : > { %s1256_s29 = smov [#allocation12]   ;;  %s1396_s28 = sadd.s32 1, %s1249_s12  }
  0x1d   : > { %s314_s26 = sshll.u32 %s1256_s29, 4  ;;  %s34_s14 = sadd.s32 1, %s1245_s11  ;;  %s315_s26 = int_to_ptr.vmem [resolvable:$true] %s314_s26 }
  0x1e   : > { %930 = dma.hbm_to_vmem [thread:$0]  (!%p1365_p11), %s313_s24, 256, %s315_s26, [#allocation11], %s1674_s18, %s1674_s18, %s1675_s21  }
  0x1f   : > { %s31_s19 = ssub.s32 %s1249_s12, %s1396_s28  ;;  %p41_p12 = scmp.ne.s32.totalorder %s1245_s11, %s1241_s10 }
  0x20   : > { %p32_p13 = scmp.eq.s32.totalorder %s31_s19, 0  ;;  %p42_p0 = scmp.eq.s32.totalorder %s1249_s12, 0 }
  0x21   : > { %p1406_p3 = por %p239_p2, %p41_p12  ;;  %p943_p5 = scmp.lt.s32.totalorder %s1249_s12, 2 }
  0x22   : > { %s1412_s22 = scalar_select %p32_p13, %s1245_s11, %s34_s14  }
  0x23   : > { %p43_p7 = por %p42_p0, %p41_p12  ;;  %s331_s23 = sand.u32 1, %s1245_s11  }
  0x24   : > { %s881_s25 = sshll.u32 %s331_s23, 4  ;;  %s896_s24 = sshll.u32 %s1249_s12, 4 }
  0x25   : > { %s340_s26 = scalar_lea.hbm %s1664_s0, %s896_s24  ;;  %s335_s18 = scalar_lea.vmem [#allocation4], %s881_s25 }
  0x26   : > { %s343_s21 = sshll.u32 %s335_s18, 4  ;;  %s341_s19 = sshll.u32 %s340_s26, 4  ;;  %s344_s21 = int_to_ptr.vmem [resolvable:$true] %s343_s21  ;;  %s342_s19 = int_to_ptr.hbm [resolvable:$true] %s341_s19 }
  0x27   : > { %p1419_p2 = pnand %p943_p5, %p43_p7  ;;  %s332_s14 = scalar_lea.sflag [#allocation5], %s331_s23 }
  0x28   : > { %s1145_s3 = sshra.s32 %s342_s19, 4  ;;  %s1152_s18 = scalar_lea.hbm %s1664_s0, 32  ;;  %s1146_s3 = int_to_ptr.hbm [resolvable:$true] %s1145_s3 }
  0x29   : > { %s1147_s5 = scalar_lea.hbm %s1146_s3, 16  ;;  %p1149_p11 = pneg %p1419_p2 }
  0x2a   : > { %p1148_p10 = scmp.ne.s32.totalorder %s1146_s3, %s1147_s5  ;;  %p1153_p0 = scmp.lt.s32.totalorder %s1146_s3, %s1664_s0 }
  0x2b   : > { %p1154_p5 = scmp.lt.s32.totalorder %s1152_s18, %s1147_s5 }
  0x2c   : > { %p1150_p12 = pnand %p1149_p11, %p1148_p10 }
  0x2d   : > { %p1155_p7 = por %p1154_p5, %p1153_p0 }
  0x2e   : > { %p1151_p13 = pneg %p1150_p12 }
  0x30   : > { %p1156_p9 = pnand %p1155_p7, %p1151_p13 }
  0x32   : > { %1159 = shalt.err (!%p1156_p9)
}
  0x33   : > { %s1688_s23 = smov 8   ;;  %s1689_s26 = smov 128  }
  0x34   : > { %934 = dma.hbm_to_vmem [thread:$0]  (!%p1419_p2), %s342_s19, 256, %s344_s21, %s332_s14, %s1689_s26, %s1689_s26, %s1688_s23  }
  0x35   : > { %355 = sbr.rel (%p1356_p8) target bundleno = 378 (0x17a), region = 56  ;;  %s1439_s24 = sand.u32 (!%p1356_p8), 1, %s1241_s10  }
  0x36   : > { %s885_s3 = sshll.u32 (!%p1356_p8), %s1439_s24, 4  ;;  %s358_s5 = scalar_lea.sflag (!%p1356_p8), [#allocation5], %s1439_s24 }
  0x37   : > { %s361_s25 = scalar_lea.vmem (!%p1356_p8), [#allocation4], %s885_s3 }
  0x3a   : > { %1220 = dma.done.wait (%p1343_p4), %s358_s5, 256  }
  0x3b   : > { %1222 = vsyncadd (%p1343_p4), %s358_s5, 4294967040 }
  0x3c   : > { %1224 = dma.done.wait (%p48_p1), [#allocation8], 272  }
  0x3d   : > { %1226 = vsyncadd (%p48_p1), [#allocation8], 4294967024 }
  0x3e   : > { %1228 = dma.done.wait (%p48_p1), [#allocation11], 512  }
  0x3f   : > { %1230 = vsyncadd (%p48_p1), [#allocation11], 4294966784  ;;  %vm461_vm0 = vcmask 516096   ;;  %v1257_v0 = vmov 0.0   ;;  %vm463_vm1 = vcmask 523264   ;;  %v1455_v1 = vld [vmem:[%s361_s25] sm:$0xff] }
  0x40   : > { %462 = vst.msk [vmem:[#allocation2 + $0x7] sm:$0x1] %vm461_vm0, %v1257_v0  ;;  %v1457_v2 = vld [vmem:[%s361_s25 + $0x8] sm:$0xff]  ;;  %s1258_s1 = smov 4   ;;  %s1259_s15 = smov 124   ;;  %vm479_vm2 = vcmask 31744  }
  0x41   : > { %466 = vst.msk [vmem:[#allocation2 + $0x18] sm:$0x1] %vm461_vm0, %v1257_v0  ;;  %519 = vrot.lane.b32.xlu2 %v1455_v1, %s1258_s1  ;;  %v996_v8 = vld [vmem:[#allocation10] ss:$0 sm:$0xff]  ;;  %v998_v9 = vld [vmem:[#allocation10 + $0x1] ss:$0 sm:$0xff] }
  0x42   : > { %623 = vst.msk [vmem:[#allocation3 + $0x7] sm:$0x1] %vm461_vm0, %v1257_v0  ;;  %vm488_vm3 = vcmask 490496   ;;  %v994_v13 = vld [vmem:[#allocation10 + $0x2] ss:$0 sm:$0xff]  ;;  %s1260_s18 = smov 64  }
  0x43   : > { %626 = vst.msk [vmem:[#allocation3 + $0x18] sm:$0x1] %vm461_vm0, %v1257_v0  ;;  %v1000_v20 = vld [vmem:[#allocation10 + $0x3] ss:$0 sm:$0xff]  ;;  %v1002_v32 = vld [vmem:[#allocation10 + $0x4] ss:$0 sm:$0xff] }
  0x44   : > { %464 = vst.msk [vmem:[#allocation2 + $0x8] sm:$0xff] %vm463_vm1, %v1455_v1  ;;  %v1004_v38 = vld [vmem:[#allocation10 + $0x5] ss:$0 sm:$0xff]  ;;  %v549_v39 = vmul.f32 %v1002_v32, %v1455_v1  ;;  %v1006_v40 = vld [vmem:[#allocation10 + $0x6] ss:$0 sm:$0xff]  ;;  %v550_v46 = vmul.f32 %v1002_v32, %v1457_v2  ;;  %s890_s23 = sshll.u32 %s1439_s24, 5 }
  0x45   : > { %465 = vst.msk [vmem:[#allocation2 + $0x10] sm:$0xff] %vm463_vm1, %v1457_v2  ;;  %v1008_v47 = vld [vmem:[#allocation10 + $0x7] ss:$0 sm:$0xff]  ;;  %v1010_v56 = vld [vmem:[#allocation10 + $0x8] ss:$0 sm:$0xff]  ;;  %s897_s26 = sshll.u32 %s1334_s13, 5 }
  0x46   : > { %s759_s13 = scalar_lea.hbm %s1673_s9, %s897_s26  ;;  %s748_s19 = scalar_lea.sflag [#allocation6], %s1439_s24 }
  0x47   : > { %s762_s21 = sshll.u32 %s759_s13, 4  ;;  %s763_s21 = int_to_ptr.hbm [resolvable:$true] %s762_s21 }
  0x48   : > { %s1189_s14 = sshra.s32 %s763_s21, 4  ;;  %s1190_s14 = int_to_ptr.hbm [resolvable:$true] %s1189_s14 }
  0x49   : > { %521 = vrot.lane.b32.xlu2 %v1457_v2, %s1258_s1  ;;  %p1196_p9 = scmp.lt.s32.totalorder %s1190_s14, %s1673_s9 }
  0x4b   : > { %v1465_v3 = vld [vmem:[#allocation2 + $0x7] sm:$0xff] }
  0x4c   : > { %482 = vrot.lane.b32.xlu1 %v1465_v3, %s1259_s15  ;;  %473 = vrot.lane.b32.xlu0 %v1465_v3, %s1258_s1  ;;  %v1473_v4 = vld [vmem:[#allocation2 + $0xf] sm:$0xff]  ;;  %v501_v15 = vmul.f32 %v998_v9, %v1465_v3 }
  0x4d   : > { %v1479_v5 = vld [vmem:[#allocation2 + $0x9] sm:$0xff]  ;;  %v1487_v6 = vld [vmem:[#allocation2 + $0x11] sm:$0xff]  ;;  %v502_v24 = vmul.f32 %v998_v9, %v1473_v4 }
  0x4e   : > { %v597_v55 = vmul.f32 %v1008_v47, %v1479_v5  ;;  %v598_v0 = vmul.f32 %v1008_v47, %v1487_v6 }
  0x51   : > { %567 = vrot.lane.b32.xlu2 %v1479_v5, %s1258_s1 }
  0x54   : > { %484 = vrot.lane.b32.xlu1 %v1473_v4, %s1259_s15  ;;  %475 = vrot.lane.b32.xlu0 %v1473_v4, %s1258_s1 }
  0x59   : > { %577 = vrot.lane.b32.xlu2 %v1487_v6, %s1259_s15 }
  0x5c   : > { %529 = vrot.lane.b32.xlu1 %v1457_v2, %s1259_s15  ;;  %527 = vrot.lane.b32.xlu0 %v1455_v1, %s1259_s15 }
  0x64   : > { %575 = vrot.lane.b32.xlu1 %v1479_v5, %s1259_s15  ;;  %569 = vrot.lane.b32.xlu0 %v1487_v6, %s1258_s1 }
  0x9b   : > { %v520_v7 = vpop.permute.xlu2 %519 }
  0x9c   : > { %v1505_v21 = vsel %vm479_vm2, 0.0, %v520_v7  ;;  %v995_v7 = vld [vmem:[#allocation9] ss:$0 sm:$0xff] }
  0x9d   : > { %v539_v30 = vmul.f32 %v1000_v20, %v1505_v21 }
  0xa3   : > { %v522_v16 = vpop.permute.xlu2 %521 }
  0xa4   : > { %v1515_v31 = vsel %vm479_vm2, 0.0, %v522_v16 }
  0xa5   : > { %v540_v36 = vmul.f32 %v1000_v20, %v1515_v31 }
  0xab   : > { %v568_v34 = vpop.permute.xlu2 %567 }
  0xac   : > { %v1520_v43 = vsel %vm479_vm2, 0.0, %v568_v34 }
  0xad   : > { %v587_v51 = vmul.f32 %v1006_v40, %v1520_v43 }
  0xb3   : > { %v578_v57 = vpop.permute.xlu2 %577 }
  0xb4   : > { %v1538_v63 = vsel %vm488_vm3, %v578_v57, 0.0 }
  0xbe   : > { %v483_v10 = vpop.permute.xlu1 %482  ;;  %v474_v11 = vpop.permute.xlu0 %473 }
  0xbf   : > { %v1496_v12 = vsel %vm479_vm2, 0.0, %v474_v11  ;;  %v1501_v17 = vsel %vm488_vm3, %v483_v10, 0.0 }
  0xc0   : > { %v495_v14 = vmul.f32 %v996_v8, %v1496_v12  ;;  %v511_v18 = vmul.f32 %v994_v13, %v1501_v17  ;;  %v492_v20 = vmul.f32 %v995_v7, %v1496_v12 }
  0xc2   : > { %v505_v19 = vadd.f32 %v501_v15, %v495_v14 }
  0xc4   : > { %v515_v29 = vadd.f32 %v511_v18, %v505_v19  ;;  %v608_v18 = vmul.f32 %v1010_v56, %v1538_v63  ;;  %v993_v19 = vld [vmem:[#allocation9 + $0x2] ss:$0 sm:$0xff] }
  0xc5   : > { %v508_v12 = vmul.f32 %v993_v19, %v1501_v17 }
  0xc6   : > { %v485_v22 = vpop.permute.xlu1 %484  ;;  %v476_v23 = vpop.permute.xlu0 %475  ;;  %v543_v37 = vadd.f32 %v539_v30, %v515_v29 }
  0xc7   : > { %v1509_v25 = vsel %vm488_vm3, %v485_v22, 0.0  ;;  %v481_v26 = vsel %vm479_vm2, 0.0, %v476_v23 }
  0xc8   : > { %v512_v27 = vmul.f32 %v994_v13, %v1509_v25  ;;  %v496_v28 = vmul.f32 %v996_v8, %v481_v26  ;;  %v553_v49 = vadd.f32 %v549_v39, %v543_v37  ;;  %v997_v8 = vld [vmem:[#allocation9 + $0x1] ss:$0 sm:$0xff]  ;;  %v1011_v13 = vld [vmem:[%s1670_s6] ss:$0 sm:$0xff] }
  0xc9   : > { %v498_v22 = vmul.f32 %v997_v8, %v1465_v3  ;;  %v999_v3 = vld [vmem:[#allocation9 + $0x3] ss:$0 sm:$0xff] }
  0xca   : > { %v506_v33 = vadd.f32 %v502_v24, %v496_v28  ;;  %v499_v28 = vmul.f32 %v997_v8, %v1473_v4  ;;  %v536_v34 = vmul.f32 %v999_v3, %v1505_v21  ;;  %v537_v17 = vmul.f32 %v999_v3, %v1515_v31 }
  0xcb   : > { %v503_v30 = vadd.f32 %v498_v22, %v492_v20 }
  0xcc   : > { %v516_v35 = vadd.f32 %v512_v27, %v506_v33  ;;  %v493_v27 = vmul.f32 %v995_v7, %v481_v26  ;;  %v509_v26 = vmul.f32 %v993_v19, %v1509_v25 }
  0xcd   : > { %v513_v4 = vadd.f32 %v508_v12, %v503_v30 }
  0xce   : > { %v530_v41 = vpop.permute.xlu1 %529  ;;  %v528_v42 = vpop.permute.xlu0 %527  ;;  %v544_v45 = vadd.f32 %v540_v36, %v516_v35  ;;  %v504_v33 = vadd.f32 %v499_v28, %v493_v27  ;;  %v1001_v35 = vld [vmem:[#allocation9 + $0x4] ss:$0 sm:$0xff] }
  0xcf   : > { %v1523_v44 = vsel %vm488_vm3, %v528_v42, 0.0  ;;  %v1527_v48 = vsel %vm488_vm3, %v530_v41, 0.0  ;;  %v541_v39 = vadd.f32 %v536_v34, %v513_v4  ;;  %v546_v25 = vmul.f32 %v1001_v35, %v1455_v1  ;;  %v1021_v28 = vld [vmem:[#allocation12 + $0x4] ss:$0 sm:$0xff] }
  0xd0   : > { %v559_v50 = vmul.f32 %v1004_v38, %v1523_v44  ;;  %v554_v53 = vadd.f32 %v550_v46, %v544_v45  ;;  %v560_v54 = vmul.f32 %v1004_v38, %v1527_v48  ;;  %v514_v37 = vadd.f32 %v509_v26, %v504_v33  ;;  %v1003_v38 = vld [vmem:[#allocation9 + $0x5] ss:$0 sm:$0xff]  ;;  %v1005_v46 = vld [vmem:[#allocation9 + $0x6] ss:$0 sm:$0xff] }
  0xd1   : > { %v547_v42 = vmul.f32 %v1001_v35, %v1457_v2  ;;  %v556_v45 = vmul.f32 %v1003_v38, %v1523_v44  ;;  %v551_v21 = vadd.f32 %v546_v25, %v541_v39  ;;  %v557_v47 = vmul.f32 %v1003_v38, %v1527_v48  ;;  %v1018_v26 = vld [vmem:[#allocation12 + $0x5] ss:$0 sm:$0xff] }
  0xd2   : > { %v563_v52 = vadd.f32 %v559_v50, %v553_v49  ;;  %v564_v9 = vadd.f32 %v560_v54, %v554_v53  ;;  %v542_v41 = vadd.f32 %v537_v17, %v514_v37  ;;  %v584_v50 = vmul.f32 %v1005_v46, %v1520_v43 }
  0xd3   : > { %v561_v49 = vadd.f32 %v556_v45, %v551_v21  ;;  %v1013_v45 = vld [vmem:[#allocation12 + $0x7] ss:$0 sm:$0xff] }
  0xd4   : > { %v591_v58 = vadd.f32 %v587_v51, %v563_v52  ;;  %v552_v31 = vadd.f32 %v547_v42, %v542_v41  ;;  %v1007_v51 = vld [vmem:[#allocation9 + $0x7] ss:$0 sm:$0xff]  ;;  %v1009_v52 = vld [vmem:[#allocation9 + $0x8] ss:$0 sm:$0xff] }
  0xd5   : > { %v595_v57 = vmul.f32 %v1007_v51, %v1487_v6 }
  0xd6   : > { %v576_v59 = vpop.permute.xlu1 %575  ;;  %v570_v60 = vpop.permute.xlu0 %569  ;;  %v601_v10 = vadd.f32 %v597_v55, %v591_v58  ;;  %v562_v54 = vadd.f32 %v557_v47, %v552_v31  ;;  %v589_v55 = vadd.f32 %v584_v50, %v561_v49 }
  0xd7   : > { %v1534_v61 = vsel %vm488_vm3, %v576_v59, 0.0  ;;  %v574_v62 = vsel %vm479_vm2, 0.0, %v570_v60 }
  0xd8   : > { %v607_v11 = vmul.f32 %v1010_v56, %v1534_v61  ;;  %v588_v14 = vmul.f32 %v1006_v40, %v574_v62  ;;  %v585_v53 = vmul.f32 %v1005_v46, %v574_v62  ;;  %v594_v56 = vmul.f32 %v1007_v51, %v1479_v5 }
  0xd9   : > { %v604_v43 = vmul.f32 %v1009_v52, %v1534_v61  ;;  %v605_v5 = vmul.f32 %v1009_v52, %v1538_v63 }
  0xda   : > { %v611_v15 = vadd.f32 %v607_v11, %v601_v10  ;;  %v592_v16 = vadd.f32 %v588_v14, %v564_v9  ;;  %v590_v48 = vadd.f32 %v585_v53, %v562_v54  ;;  %v599_v59 = vadd.f32 %v594_v56, %v589_v55  ;;  %v1012_v11 = vld [vmem:[#allocation12 + $0x1] ss:$0 sm:$0xff]  ;;  %v1016_v14 = vld [vmem:[#allocation12 + $0x2] ss:$0 sm:$0xff]  ;;  %v1023_v53 = vld [vmem:[#allocation7] ss:$0 sm:$0xff] }
  0xdc   : > { %v1548_v23 = vadd.f32 %v1011_v13, %v611_v15  ;;  %v602_v24 = vadd.f32 %v598_v0, %v592_v16  ;;  %v609_v60 = vadd.f32 %v604_v43, %v599_v59  ;;  %v600_v62 = vadd.f32 %v595_v57, %v590_v48  ;;  %v1014_v0 = vld [vmem:[%s1668_s4] ss:$0 sm:$0xff] }
  0xde   : > { %624 = vst.msk [vmem:[#allocation3 + $0x8] sm:$0xff] %vm463_vm1, %v1548_v23  ;;  %v612_v29 = vadd.f32 %v608_v18, %v602_v24  ;;  %672 = vrot.lane.b32.xlu0 %v1548_v23, %s1259_s15  ;;  %664 = vrot.lane.b32.xlu1 %v1548_v23, %s1258_s1  ;;  %v610_v6 = vadd.f32 %v605_v5, %v600_v62  ;;  %v1015_v24 = vld [vmem:[#allocation12 + $0x3] ss:$0 sm:$0xff] }
  0xdf   : > { %v616_v61 = vadd.f32 %v1014_v0, %v609_v60  ;;  %v686_v17 = vmul.f32 %v1021_v28, %v1548_v23 }
  0xe0   : > { %v1558_v32 = vadd.f32 %v1011_v13, %v612_v29  ;;  %v617_v7 = vadd.f32 %v1014_v0, %v610_v6  ;;  %v1020_v13 = vld [vmem:[#allocation12] ss:$0 sm:$0xff]  ;;  %v454_v0 = vmul.f32 %v1023_v53, %v1455_v1  ;;  %v1024_v6 = vld [vmem:[%s1666_s2] ss:$0 sm:$0xff]  ;;  %v455_v1 = vmul.f32 %v1023_v53, %v1457_v2 }
  0xe2   : > { %625 = vst.msk [vmem:[#allocation3 + $0x10] sm:$0xff] %vm463_vm1, %v1558_v32  ;;  %666 = vrot.lane.b32.xlu2 %v1558_v32, %s1258_s1  ;;  %v687_v56 = vmul.f32 %v1021_v28, %v1558_v32  ;;  %v460_v2 = vadd.f32 %v1024_v6, %v455_v1 }
  0xe5   : > { %v627_v36 = vld [vmem:[#allocation3 + $0x7] sm:$0xff] }
  0xe6   : > { %633 = vrot.lane.b32.xlu0 %v627_v36, %s1258_s1  ;;  %v653_v19 = vmul.f32 %v1012_v11, %v627_v36 }
  0xe9   : > { %v1569_v40 = vld [vmem:[#allocation3 + $0xf] sm:$0xff] }
  0xea   : > { %635 = vrot.lane.b32.xlu1 %v1569_v40, %s1258_s1  ;;  %641 = vrot.lane.b32.xlu2 %v627_v36, %s1259_s15  ;;  %v1580_v44 = vld [vmem:[#allocation3 + $0x9] sm:$0xff]  ;;  %v1589_v58 = vld [vmem:[#allocation3 + $0x11] sm:$0xff]  ;;  %v654_v37 = vmul.f32 %v1012_v11, %v1569_v40  ;;  %v1017_v36 = vld [vmem:[#allocation12 + $0x6] ss:$0 sm:$0xff]  ;;  %v459_v11 = vadd.f32 %v1024_v6, %v454_v0 }
  0xeb   : > { %v719_v54 = vmul.f32 %v1013_v45, %v1580_v44 }
  0xee   : > { %643 = vrot.lane.b32.xlu0 %v1569_v40, %s1259_s15 }
  0xf2   : > { %674 = vrot.lane.b32.xlu1 %v1558_v32, %s1259_s15  ;;  %697 = vrot.lane.b32.xlu2 %v1580_v44, %s1258_s1  ;;  %v720_v32 = vmul.f32 %v1013_v45, %v1589_v58 }
  0xf6   : > { %699 = vrot.lane.b32.xlu0 %v1589_v58, %s1258_s1 }
  0xfa   : > { %705 = vrot.lane.b32.xlu1 %v1580_v44, %s1259_s15  ;;  %707 = vrot.lane.b32.xlu2 %v1589_v58, %s1259_s15  ;;  %v1019_v44 = vld [vmem:[#allocation12 + $0x8] ss:$0 sm:$0xff]  ;;  %s416_s15 = scalar_lea.vmem [#allocation13], %s890_s23  ;;  %s1195_s23 = scalar_lea.hbm %s1673_s9, 64 }
  0xfb   : > { %s760_s20 = sshll.u32 %s416_s15, 4  ;;  %s761_s20 = int_to_ptr.vmem [resolvable:$true] %s760_s20 }
  0xfe   : > { %735 = vrot.lane.b32.xlu0 %v616_v61, %s1260_s18 }
 0x102   : > { %737 = vrot.lane.b32.xlu1 %v617_v7, %s1260_s18  ;;  %s1191_s18 = scalar_lea.hbm %s1190_s14, 32 }
 0x103   : > { %p1192_p1 = scmp.ne.s32.totalorder %s1190_s14, %s1191_s18  ;;  %p1197_p2 = scmp.lt.s32.totalorder %s1195_s23, %s1191_s18 }
 0x105   : > { %p1193_p4 = pnand %p1192_p1, %p1406_p3  ;;  %p1198_p10 = por %p1197_p2, %p1196_p9 }
 0x107   : > { %p1194_p8 = pneg %p1193_p4 }
 0x109   : > { %p1199_p11 = pnand %p1198_p10, %p1194_p8 }
 0x13c   : > { %v667_v8 = vpop.permute.xlu2 %666 }
 0x13d   : > { %v671_v25 = vsel %vm479_vm2, 0.0, %v667_v8 }
 0x13e   : > { %v682_v49 = vmul.f32 %v1015_v24, %v671_v25 }
 0x144   : > { %v642_v10 = vpop.permute.xlu2 %641 }
 0x145   : > { %v647_v16 = vsel %vm488_vm3, %v642_v10, 0.0 }
 0x146   : > { %v658_v27 = vmul.f32 %v1016_v14, %v647_v16 }
 0x14c   : > { %v698_v3 = vpop.permute.xlu2 %697 }
 0x14d   : > { %v703_v41 = vsel %vm479_vm2, 0.0, %v698_v3 }
 0x14e   : > { %v714_v50 = vmul.f32 %v1017_v36, %v703_v41 }
 0x150   : > { %v673_v9 = vpop.permute.xlu0 %672  ;;  %v665_v63 = vpop.permute.xlu1 %664 }
 0x151   : > { %v670_v22 = vsel %vm479_vm2, 0.0, %v665_v63  ;;  %v678_v35 = vsel %vm488_vm3, %v673_v9, 0.0 }
 0x152   : > { %v681_v33 = vmul.f32 %v1015_v24, %v670_v22  ;;  %v691_v46 = vmul.f32 %v1018_v26, %v678_v35 }
 0x154   : > { %v708_v48 = vpop.permute.xlu2 %707 }
 0x155   : > { %v712_v8 = vsel %vm488_vm3, %v708_v48, 0.0 }
 0x158   : > { %v634_v15 = vpop.permute.xlu0 %633 }
 0x159   : > { %v639_v18 = vsel %vm479_vm2, 0.0, %v634_v15  ;;  %v1022_v15 = vld [vmem:[%s1672_s8] ss:$0 sm:$0xff] }
 0x15a   : > { %v650_v20 = vmul.f32 %v1020_v13, %v639_v18 }
 0x15c   : > { %v655_v29 = vadd.f32 %v653_v19, %v650_v20  ;;  %v636_v12 = vpop.permute.xlu1 %635 }
 0x15d   : > { %v640_v30 = vsel %vm479_vm2, 0.0, %v636_v12 }
 0x15e   : > { %v660_v4 = vadd.f32 %v658_v27, %v655_v29  ;;  %v651_v34 = vmul.f32 %v1020_v13, %v640_v30  ;;  %v725_v13 = vmul.f32 %v1019_v44, %v712_v8 }
 0x160   : > { %v683_v38 = vadd.f32 %v681_v33, %v660_v4  ;;  %v644_v39 = vpop.permute.xlu0 %643  ;;  %v656_v31 = vadd.f32 %v654_v37, %v651_v34 }
 0x161   : > { %v648_v42 = vsel %vm488_vm3, %v644_v39, 0.0 }
 0x162   : > { %v688_v21 = vadd.f32 %v686_v17, %v683_v38  ;;  %v659_v47 = vmul.f32 %v1016_v14, %v648_v42 }
 0x164   : > { %v661_v51 = vadd.f32 %v659_v47, %v656_v31  ;;  %v675_v40 = vpop.permute.xlu1 %674  ;;  %v693_v52 = vadd.f32 %v691_v46, %v688_v21 }
 0x165   : > { %v679_v23 = vsel %vm488_vm3, %v675_v40, 0.0 }
 0x166   : > { %v684_v55 = vadd.f32 %v682_v49, %v661_v51  ;;  %v716_v43 = vadd.f32 %v714_v50, %v693_v52  ;;  %v692_v59 = vmul.f32 %v1018_v26, %v679_v23 }
 0x168   : > { %v689_v57 = vadd.f32 %v687_v56, %v684_v55  ;;  %v700_v60 = vpop.permute.xlu0 %699  ;;  %v721_v62 = vadd.f32 %v719_v54, %v716_v43 }
 0x169   : > { %v704_v5 = vsel %vm479_vm2, 0.0, %v700_v60 }
 0x16a   : > { %v694_v61 = vadd.f32 %v692_v59, %v689_v57  ;;  %v715_v7 = vmul.f32 %v1017_v36, %v704_v5 }
 0x16c   : > { %v717_v9 = vadd.f32 %v715_v7, %v694_v61  ;;  %v706_v10 = vpop.permute.xlu1 %705 }
 0x16d   : > { %v711_v63 = vsel %vm488_vm3, %v706_v10, 0.0 }
 0x16e   : > { %v722_v14 = vadd.f32 %v720_v32, %v717_v9  ;;  %v724_v16 = vmul.f32 %v1019_v44, %v711_v63 }
 0x170   : > { %v727_v58 = vadd.f32 %v725_v13, %v722_v14  ;;  %v726_v18 = vadd.f32 %v724_v16, %v721_v62  ;;  %v736_v19 = vpop.permute.xlu0 %735 }
 0x171   : > { %v741_v20 = vsel %vm463_vm1, %v459_v11, %v736_v19 }
 0x172   : > { %v731_v22 = vadd.f32 %v1022_v15, %v726_v18  ;;  %v732_v24 = vadd.f32 %v1022_v15, %v727_v58  ;;  %743 = vst [vmem:[%s416_s15] sm:$0xff] %v741_v20 }
 0x174   : > { %744 = vst.msk [vmem:[%s416_s15 + $0x8] sm:$0xff] %vm463_vm1, %v731_v22  ;;  %v738_v27 = vpop.permute.xlu1 %737 }
 0x175   : > { %746 = vst.msk [vmem:[%s416_s15 + $0x18] sm:$0xff] %vm463_vm1, %v732_v24  ;;  %v742_v28 = vsel %vm463_vm1, %v460_v2, %v738_v27 }
 0x176   : > { %745 = vst [vmem:[%s416_s15 + $0x10] sm:$0xff] %v742_v28 }
 0x177   : > { %1202 = shalt.err (!%p1199_p11)
}
 0x178   : > { %s1261_s24 = smov 256   ;;  %s1262_s5 = smov 16  }
 0x179   : > { %916 = dma.vmem_to_hbm [thread:$0]  (%p1406_p3), %s761_s20, 512, %s763_s21, %s748_s19, %s1261_s24, %s1261_s24, %s1262_s5  }
 0x17a PF: > { %s777_s25 = sand.u32 1, %s1237_s30   ;;  %p1690_p12 = scmp.ge.s32.totalorder %s1249_s12, 2 }
 0x17b   : > { %s778_s1 = scalar_lea.sflag [#allocation6], %s777_s25 }
 0x17c   : > { %p936_p13 = pnand %p1690_p12, %p1348_p6 }
 0x17e   : > { %p937_p0 = pneg %p936_p13 }
 0x180   : > { %1232 = dma.done.wait (%p937_p0), %s778_s1, 512  }
 0x181   : > { %1234 = vsyncadd (%p937_p0), %s778_s1, 4294966784  ;;  %p24_p5 = scmp.ge.s32.totalorder %s1396_s28, 4   ;;  %s1691_s30 = smov %s1241_s10 }
 0x182   : > { %s1692_s10 = smov %s1245_s11  ;;  %s1693_s11 = smov %s1412_s22 }
 0x183   : > { %s1694_s12 = smov %s1396_s28  ;;  %26 = sbr.rel (!%p24_p5) target bundleno = 11 (0xb), region = 117 }
 0x188   :  { %784 = vsyncpa [#allocation5], 1 }
 0x189   :  { %786 = vsyncpa [#allocation5 + $0x1], 1 }
 0x18a   :  { %787 = vsyncpa [#allocation8], 1 }
 0x18b   :  { %788 = vsyncpa [#allocation11], 1 }
 0x18c   :  { %789 = vsyncpa [#allocation6], 1 }
 0x18d   :  { %791 = vsyncpa [#allocation6 + $0x1], 1 }

</bundles_post_ra>
